<compile_context>
chip_gen: v7x
topology: tpu7x:2x2x1
jax: 0.10.0
libtpu: 0.0.40
codegen_flags: <defaults>
</compile_context>

<pallas_src>
import jax
import jax.numpy as jnp
from jax import lax
from jax.experimental import pallas as pl
from jax.experimental.pallas import tpu as pltpu

# consts from the original repo
NUM_Z_CHANNELS = 50
NUM_ENCODER_CHANNELS = 64
DIMS = (NUM_Z_CHANNELS,
        NUM_ENCODER_CHANNELS,
        NUM_ENCODER_CHANNELS // 2,
        NUM_ENCODER_CHANNELS // 4)          # (50, 64, 32, 16)
BN_EPS = 1e-5
LANE = 128                                   # TPU lane width
PACK = 64                                    # padded feature extent of packed params


def _round_up(a, m):
    return -(-a // m) * m


def disc_z_kernel(z_ref, wp_ref, bp_ref, out_ref):
    """MLP for one batch tile.

    z_ref  : (tile, 50)  bf16  -- natural (batch, features) layout
    wp_ref : (4, 64, 64) bf16  -- layer k weight in wp[k, :out_k, :in_k]
    bp_ref : (4, 64, 1)  f32   -- layer k (BN-folded) bias in bp[k, :out_k, 0]
    out_ref: (1, tile)   f32   -- lane-dense logits
    Activations run in transposed (features, batch) layout after layer 1.
    """
    d0, d1, d2, d3 = DIMS

    z = z_ref[...]                                            # (tile, 50) bf16

    # dz_fc_1: contract over C directly (no wrapper transpose): (64,50)x(tile,50)^T
    w1 = wp_ref[0, :d1, :d0]                                  # (64, 50) bf16
    b1 = bp_ref[0, :d1, :]                                    # (64, 1)  f32
    h = lax.dot_general(w1, z, (((1,), (1,)), ((), ())),
                        preferred_element_type=jnp.float32)   # (64, tile) f32
    h = jnp.maximum(h + b1, 0.0).astype(jnp.bfloat16)         # (64, tile) bf16

    # dz_fc_2
    w2 = wp_ref[1, :d2, :d1]                                  # (32, 64) bf16
    b2 = bp_ref[1, :d2, :]                                    # (32, 1)  f32
    h = jnp.dot(w2, h, preferred_element_type=jnp.float32)    # (32, tile) f32
    h = jnp.maximum(h + b2, 0.0).astype(jnp.bfloat16)         # (32, tile) bf16

    # dz_fc_3
    w3 = wp_ref[2, :d3, :d2]                                  # (16, 32) bf16
    b3 = bp_ref[2, :d3, :]                                    # (16, 1)  f32
    h = jnp.dot(w3, h, preferred_element_type=jnp.float32)    # (16, tile) f32
    h = jnp.maximum(h + b3, 0.0)                              # (16, tile) f32

    # dz_fc_4 (16 -> 1 logit head): VPU mul + cross-sublane (XLU) reduce.
    w4 = wp_ref[3, :d3, :1].astype(jnp.float32)               # (16, 1)
    b4 = bp_ref[3, 0:1, :]                                    # (1, 1)
    logits = jnp.sum(h * w4, axis=0, keepdims=True) + b4      # (1, tile) f32
    out_ref[...] = logits.astype(out_ref.dtype)


def _fold_params(torch_params):
    """Fold eval-mode BatchNorm1d + Linear bias into the weights and pack all
    parameters into two arrays (PyTorch layout in: W (out,in), b (out,))."""
    wp = jnp.zeros((4, PACK, PACK), jnp.float32)
    bp = jnp.zeros((4, PACK, 1), jnp.float32)
    for k, (w, b, gamma, beta, mean, var) in enumerate(torch_params[:-1]):
        scale = gamma / jnp.sqrt(var + BN_EPS)                # (out,)
        out_d, in_d = w.shape
        wp = wp.at[k, :out_d, :in_d].set(w * scale[:, None])
        bp = bp.at[k, :out_d, 0].set(scale * (b - mean) + beta)
    w4, b4 = torch_params[-1]                                 # (1, 16), (1,)
    wp = wp.at[3, :DIMS[3], :1].set(w4.T)                     # (16, 1) column
    bp = bp.at[3, 0, 0].set(b4[0])
    return wp.astype(jnp.bfloat16), bp


def discriminator_z_forward(z, torch_params, *, batch_tile=8192):
    """z: (B, NUM_Z_CHANNELS).  Returns (B, 1) float32 logits."""
    B, C = z.shape
    assert C == DIMS[0]

    wp, bp = _fold_params(torch_params)

    # Lane-aligned batch tile, large by default to amortise per-step overhead.
    b_ceil = _round_up(B, LANE)
    tile = min(_round_up(batch_tile, LANE), b_ceil)
    # Keep >= 2 grid steps whenever the batch spans more than one lane-tile so
    # the "parallel" axis can shard across both v7x TensorCores.
    if tile == b_ceil and b_ceil >= 2 * LANE:
        tile = _round_up(-(-B // 2), LANE)
    num_tiles = -(-B // tile)
    B_pad = num_tiles * tile

    # bf16 input stream, natural (B, C) layout (no wrapper transpose).
    # Only sub-tile batches get zero-padded (cheap); otherwise the ragged tail
    # of the last block holds undefined rows -- safe: those output columns are
    # sliced off below and there is no cross-batch reduction in the kernel.
    z_in = z.astype(jnp.bfloat16)
    if B < tile:
        z_in = jnp.pad(z_in, ((0, tile - B), (0, 0)))

    grid_spec = pltpu.PrefetchScalarGridSpec(
        num_scalar_prefetch=0,
        grid=(num_tiles,),
        in_specs=[
            pl.BlockSpec((tile, C), lambda i: (i, 0)),        # streamed input
            pl.BlockSpec(wp.shape, lambda i: (0, 0, 0)),      # packed weights
            pl.BlockSpec(bp.shape, lambda i: (0, 0, 0)),      # packed biases
        ],
        out_specs=pl.BlockSpec((1, tile), lambda i: (0, i)),  # lane-dense logits
    )

    out_t = pl.pallas_call(
        disc_z_kernel,
        out_shape=jax.ShapeDtypeStruct((1, B_pad), jnp.float32),
        grid_spec=grid_spec,
        compiler_params=pltpu.CompilerParams(
            dimension_semantics=("parallel",),
            vmem_limit_bytes=(32 * 1024 * 1024) if tile >= 4096 else None,
        ),
    )(z_in, wp, bp)

    return out_t[0, :B].reshape(B, 1)


def init_torch_style_params(key):
    """Deterministic synthetic parameters in PyTorch layout (W:(out,in), b:(out,))."""
    dims_all = DIMS + (1,)
    params = []
    keys = jax.random.split(key, 6 * (len(dims_all) - 1))
    ki = 0
    for li, (in_dim, out_dim) in enumerate(zip(dims_all[:-1], dims_all[1:])):
        bound = 1.0 / float(in_dim) ** 0.5
        w = jax.random.uniform(keys[ki], (out_dim, in_dim),
                               minval=-bound, maxval=bound, dtype=jnp.float32); ki += 1
        b = jax.random.uniform(keys[ki], (out_dim,),
                               minval=-bound, maxval=bound, dtype=jnp.float32); ki += 1
        if li < len(DIMS) - 1:
            # non-trivial BN stats so the folding is actually exercised
            gamma = jax.random.uniform(keys[ki], (out_dim,), minval=0.5, maxval=1.5,
                                       dtype=jnp.float32); ki += 1
            beta = 0.1 * jax.random.normal(keys[ki], (out_dim,), dtype=jnp.float32); ki += 1
            mean = 0.1 * jax.random.normal(keys[ki], (out_dim,), dtype=jnp.float32); ki += 1
            var = jax.random.uniform(keys[ki], (out_dim,), minval=0.5, maxval=1.5,
                                     dtype=jnp.float32); ki += 1
            params.append((w, b, gamma, beta, mean, var))
        else:
            ki += 4
            params.append((w, b))
    return params


def reference_forward(z, torch_params):
    """Pure-JAX f32 reference, mirrors the PyTorch module (eval-mode BatchNorm1d)."""
    h = z
    for w, b, gamma, beta, mean, var in torch_params[:-1]:
        h = h @ w.T + b
        h = (h - mean) / jnp.sqrt(var + BN_EPS) * gamma + beta
        h = jnp.maximum(h, 0.0)
    w4, b4 = torch_params[-1]
    return h @ w4.T + b4


if __name__ == "__main__":
    key = jax.random.PRNGKey(0)
    k_z, k_p = jax.random.split(key)

    B = 16
    z = jax.random.normal(k_z, (B, NUM_Z_CHANNELS), dtype=jnp.float32)
    params = init_torch_style_params(k_p)

    out = discriminator_z_forward(z, params)
    out = jax.block_until_ready(out)

    ref = reference_forward(z, params)
    assert out.shape == (B, 1)
    # bf16 streamed operands -> looser tolerance than the pure-f32 variant.
    assert jnp.allclose(out, ref, atol=3e-2, rtol=3e-2), "mismatch vs JAX reference"

    print("KERNEL_OK")
</pallas_src>

<mosaic_0001>
module attributes {stable_mosaic.version = 11 : i64} {
  func.func @disc_z_kernel(%arg0: i32, %arg1: memref<128x50xbf16, #tpu.memory_space<vmem>>, %arg2: memref<4x64x64xbf16, #tpu.memory_space<vmem>>, %arg3: memref<4x64x1xf32, #tpu.memory_space<vmem>>, %arg4: memref<1x128xf32, #tpu.memory_space<vmem>>) attributes {dimension_semantics = [#tpu.dimension_semantics<parallel>], iteration_bounds = array<i64: 1>, scalar_prefetch = 0 : i64, scratch_operands = 0 : i64, tpu.core_type = #tpu.core_type<tc>, window_params = [{transform_indices = @transform_0, window_bounds = array<i64: 128, 50>}, {pipeline_mode = #tpu.pipeline_mode<synchronous>, transform_indices = @transform_1, window_bounds = array<i64: 4, 64, 64>}, {pipeline_mode = #tpu.pipeline_mode<synchronous>, transform_indices = @transform_2, window_bounds = array<i64: 4, 64, 1>}, {transform_indices = @transform_3, window_bounds = array<i64: 1, 128>}]} {
    %c0 = arith.constant 0 : index
    %c0_0 = arith.constant 0 : index
    %0 = vector.load %arg1[%c0, %c0_0] : memref<128x50xbf16, #tpu.memory_space<vmem>>, vector<128x50xbf16>
    %c0_1 = arith.constant 0 : index
    %c0_2 = arith.constant 0 : index
    %c0_3 = arith.constant 0 : index
    %1 = vector.load %arg2[%c0_1, %c0_2, %c0_3] : memref<4x64x64xbf16, #tpu.memory_space<vmem>>, vector<1x64x50xbf16>
    %2 = vector.shape_cast %1 : vector<1x64x50xbf16> to vector<64x50xbf16>
    %c0_4 = arith.constant 0 : index
    %c0_5 = arith.constant 0 : index
    %c0_6 = arith.constant 0 : index
    %3 = vector.load %arg3[%c0_4, %c0_5, %c0_6] : memref<4x64x1xf32, #tpu.memory_space<vmem>>, vector<1x64x1xf32>
    %4 = vector.shape_cast %3 : vector<1x64x1xf32> to vector<64x1xf32>
    %cst = arith.constant dense<0.000000e+00> : vector<64x128xf32>
    %5 = tpu.matmul %2, %0, %cst {dimension_numbers = #tpu.dot_dimension_numbers<[1], [1], [0], [0], [0, 0, 1, 0], [], []>} : vector<64x50xbf16>, vector<128x50xbf16>, vector<64x128xf32> -> vector<64x128xf32>
    %6 = vector.broadcast %4 : vector<64x1xf32> to vector<64x128xf32>
    %7 = arith.addf %5, %6 : vector<64x128xf32>
    %cst_7 = arith.constant 0.000000e+00 : f32
    %8 = vector.broadcast %cst_7 : f32 to vector<64x128xf32>
    %9 = arith.maximumf %7, %8 : vector<64x128xf32>
    %10 = arith.truncf %9 : vector<64x128xf32> to vector<64x128xbf16>
    %c1 = arith.constant 1 : index
    %c0_8 = arith.constant 0 : index
    %c0_9 = arith.constant 0 : index
    %11 = vector.load %arg2[%c1, %c0_8, %c0_9] : memref<4x64x64xbf16, #tpu.memory_space<vmem>>, vector<1x32x64xbf16>
    %12 = vector.shape_cast %11 : vector<1x32x64xbf16> to vector<32x64xbf16>
    %c1_10 = arith.constant 1 : index
    %c0_11 = arith.constant 0 : index
    %c0_12 = arith.constant 0 : index
    %13 = vector.load %arg3[%c1_10, %c0_11, %c0_12] : memref<4x64x1xf32, #tpu.memory_space<vmem>>, vector<1x32x1xf32>
    %14 = vector.shape_cast %13 : vector<1x32x1xf32> to vector<32x1xf32>
    %cst_13 = arith.constant dense<0.000000e+00> : vector<32x128xf32>
    %15 = tpu.matmul %12, %10, %cst_13 {dimension_numbers = #tpu.dot_dimension_numbers<[1], [0], [0], [1], [0, 0, 1, 1], [], []>} : vector<32x64xbf16>, vector<64x128xbf16>, vector<32x128xf32> -> vector<32x128xf32>
    %16 = vector.broadcast %14 : vector<32x1xf32> to vector<32x128xf32>
    %17 = arith.addf %15, %16 : vector<32x128xf32>
    %cst_14 = arith.constant 0.000000e+00 : f32
    %18 = vector.broadcast %cst_14 : f32 to vector<32x128xf32>
    %19 = arith.maximumf %17, %18 : vector<32x128xf32>
    %20 = arith.truncf %19 : vector<32x128xf32> to vector<32x128xbf16>
    %c2 = arith.constant 2 : index
    %c0_15 = arith.constant 0 : index
    %c0_16 = arith.constant 0 : index
    %21 = vector.load %arg2[%c2, %c0_15, %c0_16] : memref<4x64x64xbf16, #tpu.memory_space<vmem>>, vector<1x16x32xbf16>
    %22 = vector.shape_cast %21 : vector<1x16x32xbf16> to vector<16x32xbf16>
    %c2_17 = arith.constant 2 : index
    %c0_18 = arith.constant 0 : index
    %c0_19 = arith.constant 0 : index
    %23 = vector.load %arg3[%c2_17, %c0_18, %c0_19] : memref<4x64x1xf32, #tpu.memory_space<vmem>>, vector<1x16x1xf32>
    %24 = vector.shape_cast %23 : vector<1x16x1xf32> to vector<16x1xf32>
    %cst_20 = arith.constant dense<0.000000e+00> : vector<16x128xf32>
    %25 = tpu.matmul %22, %20, %cst_20 {dimension_numbers = #tpu.dot_dimension_numbers<[1], [0], [0], [1], [0, 0, 1, 1], [], []>} : vector<16x32xbf16>, vector<32x128xbf16>, vector<16x128xf32> -> vector<16x128xf32>
    %26 = vector.broadcast %24 : vector<16x1xf32> to vector<16x128xf32>
    %27 = arith.addf %25, %26 : vector<16x128xf32>
    %cst_21 = arith.constant 0.000000e+00 : f32
    %28 = vector.broadcast %cst_21 : f32 to vector<16x128xf32>
    %29 = arith.maximumf %27, %28 : vector<16x128xf32>
    %c3 = arith.constant 3 : index
    %c0_22 = arith.constant 0 : index
    %c0_23 = arith.constant 0 : index
    %30 = vector.load %arg2[%c3, %c0_22, %c0_23] : memref<4x64x64xbf16, #tpu.memory_space<vmem>>, vector<1x16x1xbf16>
    %31 = vector.shape_cast %30 : vector<1x16x1xbf16> to vector<16x1xbf16>
    %32 = arith.extf %31 : vector<16x1xbf16> to vector<16x1xf32>
    %c3_24 = arith.constant 3 : index
    %c0_25 = arith.constant 0 : index
    %c0_26 = arith.constant 0 : index
    %33 = vector.load %arg3[%c3_24, %c0_25, %c0_26] : memref<4x64x1xf32, #tpu.memory_space<vmem>>, vector<1x1x1xf32>
    %34 = vector.shape_cast %33 : vector<1x1x1xf32> to vector<1x1xf32>
    %35 = vector.broadcast %32 : vector<16x1xf32> to vector<16x128xf32>
    %36 = arith.mulf %29, %35 : vector<16x128xf32>
    %cst_27 = arith.constant dense<0.000000e+00> : vector<128xf32>
    %37 = vector.multi_reduction <add>, %36, %cst_27 [0] : vector<16x128xf32> to vector<128xf32>
    %38 = vector.shape_cast %37 : vector<128xf32> to vector<1x128xf32>
    %39 = vector.broadcast %34 : vector<1x1xf32> to vector<1x128xf32>
    %40 = arith.addf %38, %39 : vector<1x128xf32>
    %c0_28 = arith.constant 0 : index
    %c0_29 = arith.constant 0 : index
    %41 = vector.load %arg4[%c0_28, %c0_29] : memref<1x128xf32, #tpu.memory_space<vmem>>, vector<1x128xf32>
    tpu.vector_store %arg4[%c0_28, %c0_29], %40 {strides = array<i32>} : memref<1x128xf32, #tpu.memory_space<vmem>>, vector<1x128xf32>,
    return
  }
  func.func @transform_0(%arg0: i32) -> (i32, i32) {
    %c0_i32 = arith.constant 0 : i32
    %c0_i32_0 = arith.constant 0 : i32
    return %arg0, %c0_i32 : i32, i32
  }
  func.func @transform_1(%arg0: i32) -> (i32, i32, i32) {
    %c0_i32 = arith.constant 0 : i32
    %c0_i32_0 = arith.constant 0 : i32
    %c0_i32_1 = arith.constant 0 : i32
    %c0_i32_2 = arith.constant 0 : i32
    return %c0_i32, %c0_i32_0, %c0_i32_1 : i32, i32, i32
  }
  func.func @transform_2(%arg0: i32) -> (i32, i32, i32) {
    %c0_i32 = arith.constant 0 : i32
    %c0_i32_0 = arith.constant 0 : i32
    %c0_i32_1 = arith.constant 0 : i32
    %c0_i32_2 = arith.constant 0 : i32
    return %c0_i32, %c0_i32_0, %c0_i32_1 : i32, i32, i32
  }
  func.func @transform_3(%arg0: i32) -> (i32, i32) {
    %c0_i32 = arith.constant 0 : i32
    %c0_i32_0 = arith.constant 0 : i32
    return %c0_i32, %arg0 : i32, i32
  }
}

</mosaic_0001>

<bundles_post_ra>
// kernel: tpu_custom_call.1
= control target key start
LH: loop header
LB: loop body
LE: loop exit
PB: predicated region body
PF: predicated region fallthrough
CT: control target
= control target key end

     0   :  { %vm148_vm0 = vcmask 408576   ;;  %v644_v3 = vmov 0   ;;  %s795_s0 = inlined_call_operand.vmem [shape: bf16[128,50], index: 0, kind: input, shape index: {}]   ;;  %s796_s1 = inlined_call_operand.vmem [shape: bf16[4,64,64], index: 1, kind: input, shape index: {}]   ;;  %s797_s2 = inlined_call_operand.vmem [shape: f32[4,64,1], index: 2, kind: input, shape index: {}]   ;;  %s798_s3 = inlined_call_operand.hbm [shape: f32[1,128], index: 3, kind: output, shape index: {}]  }
   0x1   :  { %v605_v0 = vld [vmem:[%s795_s0] sm:$0xff]   ;;  %v606_v1 = vld [vmem:[%s795_s0 + $0x8] sm:$0xff]   ;;  %598 = vset.pattern.permute.xlu0 %v644_v3  ;;  %599 = vset.pattern.permute.xlu1 %v644_v3  ;;  %v607_v4 = vld [vmem:[%s795_s0 + $0x10] sm:$0xff]  }
   0x2   :  { %586 = vmatprep.subr.msk.bf16.mxu0 %vm148_vm0, %v605_v0  ;;  %v162_v2 = vsel %vm148_vm0, %v605_v0, 0  ;;  %v165_v5 = vsel %vm148_vm0, %v606_v1, 0  ;;  %v613_v6 = vld [vmem:[%s796_s1] sm:$0xff]   ;;  %v42_v8 = vld [vmem:[%s797_s2 + $0x10] sm:$0xff]  ;;  %v41_v9 = vld [vmem:[%s797_s2 + $0x8] sm:$0xff]  ;;  %v168_v11 = vsel %vm148_vm0, %v607_v4, 0 }
   0x3   :  { %543 = vmatpush3.bf16.xpose.msra.mxu0 %v162_v2  ;;  %558 = vmatprep.mubr.msk.bf16.mxu0 %vm148_vm0, %v613_v6  ;;  %v40_v7 = vld [vmem:[%s797_s2] sm:$0xff]  ;;  %v43_v10 = vld [vmem:[%s797_s2 + $0x18] sm:$0xff]  ;;  %v45_v14 = vld [vmem:[%s797_s2 + $0x28] sm:$0xff] }
   0x4   :  { %587 = vmatprep.subr.msk.bf16.mxu0 %vm148_vm0, %v606_v1  ;;  %50 = vperm.xlu0 %598, %v40_v7   ;;  %v608_v12 = vld [vmem:[%s795_s0 + $0x18] sm:$0xff]   ;;  %v44_v13 = vld [vmem:[%s797_s2 + $0x20] sm:$0xff] }
   0x5   :  { %60 = vperm.xlu1 %599, %v42_v8  }
   0x8   :  { %55 = vperm.xlu0 %598, %v41_v9  }
   0x9   :  { %65 = vperm.xlu1 %599, %v43_v10  }
   0xb   :  { %545 = vmatpush3.bf16.xpose.msra.mxu0 %v165_v5 }
   0xc   :  { %588 = vmatprep.subr.msk.bf16.mxu0 %vm148_vm0, %v607_v4 }
  0x13   :  { %547 = vmatpush3.bf16.xpose.msra.mxu0 %v168_v11 }
  0x14   :  { %8 = vsyncpa [#allocation3], 0  ;;  %589 = vmatprep.subr.msk.bf16.mxu0 %vm148_vm0, %v608_v12  ;;  %70 = vperm.xlu0 %598, %v44_v13   ;;  %v46_v15 = vld [vmem:[%s797_s2 + $0x30] sm:$0xff]  ;;  %v47_v16 = vld [vmem:[%s797_s2 + $0x38] sm:$0xff]  ;;  %v171_v17 = vsel %vm148_vm0, %v608_v12, 0  ;;  %vm302_vm1 = vcmask 523264  }
  0x15   :  { %75 = vperm.xlu1 %599, %v45_v14   ;;  %v609_v18 = vld [vmem:[%s795_s0 + $0x20] sm:$0xff]   ;;  %v500_v20 = vld [vmem:[%s797_s2 + $0x48] sm:$0xff]  ;;  %v501_v21 = vld [vmem:[%s797_s2 + $0x50] sm:$0xff]  ;;  %v645_v14 = vmov 0.0   ;;  %vm646_vm2 = vmmov 0   ;;  %vm385_vm3 = vcmask 261120  }
  0x16   :  { %v499_v19 = vld [vmem:[%s797_s2 + $0x40] sm:$0xff]  ;;  %v502_v22 = vld [vmem:[%s797_s2 + $0x58] sm:$0xff]  ;;  %v174_v24 = vsel %vm148_vm0, %v609_v18, 0  ;;  %v610_v25 = vld [vmem:[%s795_s0 + $0x28] sm:$0xff]  }
  0x17   :  { %v520_v23 = vld [vmem:[%s796_s1 + $0x60] sm:$0xff]   ;;  %v510_v29 = vld [vmem:[%s797_s2 + $0x88] sm:$0xff]  ;;  %v177_v32 = vsel %vm148_vm0, %v610_v25, 0  ;;  %v611_v33 = vld [vmem:[%s795_s0 + $0x30] sm:$0xff]  }
  0x18   :  { %80 = vperm.xlu0 %598, %v46_v15   ;;  %v518_v26 = vunpack.c.l.bf16 %v520_v23  ;;  %v519_v27 = vunpack.c.h.bf16 %v520_v23  ;;  %v509_v28 = vld [vmem:[%s797_s2 + $0x80] sm:$0xff]  ;;  %v180_v34 = vsel %vm148_vm0, %v611_v33, 0  ;;  %v612_v35 = vld [vmem:[%s795_s0 + $0x38] sm:$0xff]   ;;  %v614_v37 = vld [vmem:[%s796_s1 + $0x8] sm:$0xff]  }
  0x19   :  { %85 = vperm.xlu1 %599, %v47_v16   ;;  %v515_v31 = vld [vmem:[%s797_s2 + $0xc0] sm:$0x1]  ;;  %v183_v36 = vsel %vm148_vm0, %v612_v35, 0  ;;  %v615_v38 = vld [vmem:[%s796_s1 + $0x10] sm:$0xff]   ;;  %v616_v39 = vld [vmem:[%s796_s1 + $0x18] sm:$0xff]  }
  0x1a   :  { %v600_v30 = vpack.i.bf16 %v519_v27, %v518_v26  ;;  %v617_v40 = vld [vmem:[%s796_s1 + $0x20] sm:$0xff]   ;;  %v618_v13 = vld [vmem:[%s796_s1 + $0x28] sm:$0xff]  }
  0x1b   :  { %549 = vmatpush3.bf16.xpose.msra.mxu0 %v171_v17  ;;  %574 = vmatprep.mubr.msk.bf16.mxu1 %vm302_vm1, %v617_v40 }
  0x1c   :  { %590 = vmatprep.subr.msk.bf16.mxu0 %vm148_vm0, %v609_v18  ;;  %274 = vperm.xlu0 %598, %v499_v19  }
  0x1d   :  { %279 = vperm.xlu1 %599, %v500_v20  }
  0x20   :  { %284 = vperm.xlu0 %598, %v501_v21  }
  0x21   :  { %289 = vperm.xlu1 %599, %v502_v22  }
  0x23   :  { %551 = vmatpush3.bf16.xpose.msra.mxu0 %v174_v24 }
  0x24   :  { %591 = vmatprep.subr.msk.bf16.mxu0 %vm148_vm0, %v610_v25  ;;  %372 = vperm.xlu0 %598, %v509_v28  }
  0x25   :  { %377 = vperm.xlu1 %599, %v510_v29  }
  0x28   :  { %601 = vperm.xlu0 %598, %v600_v30  }
  0x29   :  { %460 = vperm.xlu1 %599, %v515_v31  }
  0x2b   :  { %553 = vmatpush3.bf16.xpose.msra.mxu0 %v177_v32 }
  0x2c   :  { %592 = vmatprep.subr.msk.bf16.mxu0 %vm148_vm0, %v611_v33  ;;  %v619_v33 = vld [vmem:[%s796_s1 + $0x40] sm:$0xff]   ;;  %s647_s1 = smov [#allocation2]  }
  0x2d   :  { %s471_s18 = sshll.u32 %s647_s1, 4  ;;  %s472_s18 = int_to_ptr.vmem [resolvable:$true] %s471_s18 }
  0x2e   :  { %s620_s19 = scalar_lea.vmem %s472_s18, 16  ;;  %s624_s20 = scalar_lea.vmem %s472_s18, 32 }
  0x2f   :  { %p621_p0 = scmp.ne.s32.totalorder %s472_s18, %s620_s19  ;;  %p625_p1 = scmp.lt.s32.totalorder %s472_s18, %s472_s18 }
  0x30   :  { %p626_p2 = scmp.lt.s32.totalorder %s624_s20, %s620_s19 }
  0x32   :  { %p627_p3 = por %p626_p2, %p625_p1 }
  0x33   :  { %555 = vmatpush3.bf16.xpose.msra.mxu0 %v180_v34 }
  0x34   :  { %593 = vmatprep.subr.msk.bf16.mxu0 %vm148_vm0, %v612_v35  ;;  %p628_p4 = pnand %p627_p3, %p621_p0 }
  0x3b   :  { %557 = vmatpush3.bf16.xpose.msra.mxu0 %v183_v36 }
  0x42   :  { %559 = vmatmul.mubr.msk.bf16.vlgmr.msra.gmra.mrb[0].mxu0 %vm148_vm0, %v614_v37 }
  0x43   :  { %562 = vmatprep.mubr.msk.bf16.mxu0 %vm148_vm0, %v615_v38 }
  0x4a   :  { %563 = vmatmul.mubr.msk.bf16.gmra.mrb[4].mxu0 %vm148_vm0, %v616_v39 }
  0x83   :  { %v51_v41 = vpop.permute.xlu0 %50 }
  0x84   :  { %v61_v42 = vpop.permute.xlu1 %60 }
  0x87   :  { %v56_v43 = vpop.permute.xlu0 %55 }
  0x88   :  { %v66_v44 = vpop.permute.xlu1 %65 }
  0x93   :  { %v71_v48 = vpop.permute.xlu0 %70 }
  0x94   :  { %v76_v53 = vpop.permute.xlu1 %75 }
  0x97   :  { %v81_v60 = vpop.permute.xlu0 %80 }
  0x98   :  { %v86_v1 = vpop.permute.xlu1 %85 }
  0x9b   :  { %v275_v15 = vpop.permute.xlu0 %274 }
  0x9c   :  { %v280_v16 = vpop.permute.xlu1 %279 }
  0x9f   :  { %v285_v17 = vpop.permute.xlu0 %284 }
  0xa0   :  { %v290_v21 = vpop.permute.xlu1 %289 }
  0xa3   :  { %v373_v34 = vpop.permute.xlu0 %372 }
  0xa4   :  { %v378_v36 = vpop.permute.xlu1 %377 }
  0xa7   :  { %v602_v39 = vpop.permute.xlu0 %601 }
 0x115   :  { %v560_v45 = vpop.f32.mrb[0].mxu0 }
 0x116   :  { %v228_v46 = vadd.f32 %v560_v45, %v61_v42  ;;  %v219_v47 = vpop.f32.mrb[1].mxu0  ;;  %v603_v45 = vunpack.i.l.bf16 %v602_v39 }
 0x117   :  { %v220_v49 = vadd.f32 %v219_v47, %v51_v41  ;;  %v561_v50 = vpop.f32.mrb[2].mxu0 }
 0x118   :  { %v231_v51 = vadd.f32 %v561_v50, %v66_v44  ;;  %v222_v52 = vpop.f32.mrb[3].mxu0  ;;  %v252_v55 = vmax.f32 %v228_v46, 0.0  ;;  %v604_v44 = vunpack.i.h.bf16 %v602_v39 }
 0x119   :  { %v223_v54 = vadd.f32 %v222_v52, %v56_v43  ;;  %v250_v57 = vmax.f32 %v220_v49, 0.0 }
 0x11a   :  { %v253_v56 = vmax.f32 %v231_v51, 0.0 }
 0x11b   :  { %v251_v58 = vmax.f32 %v223_v54, 0.0 }
 0x11c   :  { %v259_v59 = vpack.c.bf16 %v253_v56, %v252_v55  ;;  %v461_v56 = vpop.permute.xlu1 %460 }
 0x11d   :  { %v564_v61 = vpop.f32.mrb[4].mxu0  ;;  %v258_v62 = vpack.c.bf16 %v251_v58, %v250_v57 }
 0x11e   :  { %v244_v63 = vadd.f32 %v564_v61, %v81_v60  ;;  %v235_v0 = vpop.f32.mrb[5].mxu0 }
 0x11f   :  { %v236_v2 = vadd.f32 %v235_v0, %v71_v48  ;;  %v565_v3 = vpop.f32.mrb[6].mxu0  ;;  %566 = vmatprep.subr.bf16.mxu1 %v258_v62 }
 0x120   :  { %v247_v4 = vadd.f32 %v565_v3, %v86_v1  ;;  %v238_v5 = vpop.f32.mrb[7].mxu0  ;;  %567 = vmatpush3.bf16.msra.mxu1 %v258_v62  ;;  %v256_v7 = vmax.f32 %v244_v63, 0.0 }
 0x121   :  { %v239_v6 = vadd.f32 %v238_v5, %v76_v53  ;;  %568 = vmatprep.subr.bf16.mxu1 %v259_v59  ;;  %v254_v9 = vmax.f32 %v236_v2, 0.0 }
 0x122   :  { %v257_v8 = vmax.f32 %v247_v4, 0.0 }
 0x123   :  { %v255_v10 = vmax.f32 %v239_v6, 0.0 }
 0x124   :  { %v261_v11 = vpack.c.bf16 %v257_v8, %v256_v7  ;;  %569 = vmatpush3.bf16.msra.mxu1 %v259_v59 }
 0x125   :  { %v260_v12 = vpack.c.bf16 %v255_v10, %v254_v9 }
 0x127   :  { %570 = vmatprep.subr.bf16.mxu1 %v260_v12 }
 0x128   :  { %571 = vmatpush3.bf16.msra.mxu1 %v260_v12 }
 0x129   :  { %572 = vmatprep.subr.bf16.mxu1 %v261_v11 }
 0x12c   :  { %573 = vmatpush3.bf16.msra.mxu1 %v261_v11 }
 0x12d   :  { %578 = vmatprep.subr.bf16.mxu1 %v645_v14 }
 0x12f   :  { %575 = vmatmul.mubr.msk.bf16.vlgmr.msra.gmra.mrb[0].mxu1 %vm302_vm1, %v618_v13 }
 0x130   :  { %582 = vmatprep.mubr.msk.bf16.mxu1 %vm646_vm2, %v645_v14 }
 0x202   :  { %v576_v18 = vpop.f32.mrb[0].mxu1 }
 0x203   :  { %v352_v19 = vadd.f32 %v576_v18, %v285_v17  ;;  %v343_v20 = vpop.f32.mrb[1].mxu1 }
 0x204   :  { %v344_v22 = vadd.f32 %v343_v20, %v275_v15  ;;  %v577_v23 = vpop.f32.mrb[2].mxu1 }
 0x205   :  { %v355_v24 = vadd.f32 %v577_v23, %v290_v21  ;;  %v346_v25 = vpop.f32.mrb[3].mxu1  ;;  %v360_v27 = vmax.f32 %v352_v19, 0.0 }
 0x206   :  { %v347_v26 = vadd.f32 %v346_v25, %v280_v16  ;;  %v358_v29 = vmax.f32 %v344_v22, 0.0 }
 0x207   :  { %v361_v28 = vmax.f32 %v355_v24, 0.0 }
 0x208   :  { %v359_v30 = vmax.f32 %v347_v26, 0.0 }
 0x209   :  { %v363_v31 = vpack.c.bf16 %v361_v28, %v360_v27 }
 0x20a   :  { %v362_v32 = vpack.c.bf16 %v359_v30, %v358_v29 }
 0x20c   :  { %579 = vmatpush3.bf16.msra.mxu1 %v362_v32 }
 0x20d   :  { %580 = vmatprep.subr.bf16.mxu1 %v645_v14 }
 0x210   :  { %581 = vmatpush3.bf16.msra.mxu1 %v363_v31 }
 0x213   :  { %583 = vmatmul.mubr.msk.bf16.vlgmr.msra.gmra.mrb[4].mxu1 %vm385_vm3, %v619_v33 }
 0x2e6   :  { %v423_v35 = vpop.f32.mrb[4].mxu1 }
 0x2e7   :  { %v424_v37 = vadd.f32 %v423_v35, %v373_v34  ;;  %v584_v38 = vpop.f32.mrb[5].mxu1 }
 0x2e8   :  { %v426_v40 = vpop.f32.mrb[6].mxu1 }
 0x2e9   :  { %v430_v41 = vmax.f32 %v424_v37, 0.0  ;;  %v427_v42 = vadd.f32 %v426_v40, %v378_v36  ;;  %v585_v43 = vpop.f32.mrb[7].mxu1 }
 0x2eb   :  { %v431_v46 = vmax.f32 %v427_v42, 0.0  ;;  %v449_v47 = vmul.f32 %v603_v45, %v430_v41 }
 0x2ed   :  { %v450_v48 = vmul.f32 %v604_v44, %v431_v46 }
 0x2ef   :  { %v451_v49 = vadd.f32 %v450_v48, %v449_v47 }
 0x2f1   :  { %v452_v50 = vrot.slane %v451_v49, 4 }
 0x2f3   :  { %v453_v51 = vadd.f32 %v452_v50, %v451_v49 }
 0x2f5   :  { %v454_v52 = vrot.slane %v453_v51, 2 }
 0x2f7   :  { %v455_v53 = vadd.f32 %v454_v52, %v453_v51 }
 0x2f9   :  { %v456_v54 = vrot.slane %v455_v53, 1 }
 0x2fb   :  { %v457_v55 = vadd.f32 %v456_v54, %v455_v53 }
 0x2fd   :  { %v463_v57 = vadd.f32 %v461_v56, %v457_v55 }
 0x2ff   :  { %464 = vst [vmem:[#allocation2] sm:$0x1] %v463_v57 }
 0x300   :  { %631 = shalt.err (!%p628_p4)
}
 0x301   :  { %s632_s23 = scalar_lea.hbm %s798_s3, 16 }
 0x302   :  { %p633_p5 = scmp.ne.s32.totalorder %s798_s3, %s632_s23  ;;  %p636_p6 = scmp.lt.u32.totalorder %s632_s23, %s798_s3 }
 0x304   :  { %p638_p7 = pnand %p636_p6, %p633_p5 }
 0x306   :  { %641 = shalt.err (!%p638_p7)
}
 0x307   :  { %474 = dma.vmem_to_hbm [thread:$0]  %s472_s18, 16, %s798_s3, [#allocation3]  }
 0x308   :  { %642 = dma.done.wait [#allocation3], 16  }
 0x309   :  { %643 = vsyncadd [#allocation3], 4294967280 }
 0x30a   :  { %478 = vsyncpa [#allocation3], 1 }

</bundles_post_ra>
